<compile_context>
chip_gen: v7x
topology: tpu7x:2x2x1
jax: 0.10.0
libtpu: 0.0.40
codegen_flags: <defaults>
</compile_context>

<pallas_src>
import functools

import jax
import jax.numpy as jnp
from jax.experimental import pallas as pl
from jax.experimental.pallas import tpu as pltpu


def _round_up(x, m):
    return ((x + m - 1) // m) * m


def _tpu_generation_params():
    """(vmem_capacity_bytes, tensorcores_per_chip) with safe fallbacks."""
    vmem_cap = 128 << 20
    cores = 1
    try:
        info = pltpu.get_tpu_info()
        vmem_cap = int(getattr(info, "vmem_capacity_bytes", vmem_cap))
    except Exception:
        pass
    try:
        if "v7" in jax.devices()[0].device_kind.lower():
            cores = 2
    except Exception:
        pass
    if vmem_cap <= (64 << 20):  # v7x: 64 MiB VMEM per TC, 2 TCs per chip
        cores = max(cores, 2)
    return vmem_cap, cores


def _need_bytes(tb, s, dp, cp, x_buffers):
    """Conservative per-step VMEM working-set estimate (bf16 x / weights)."""
    rows = tb * s
    x_b = x_buffers * rows * dp * 2             # multi-buffered bf16 x blocks
    w_b = 2 * (dp * cp + cp * cp) * 2           # double-buffered bf16 weights
    sh_b = 2 * 2 * cp * 4                       # double-buffered f32 shifts
    out_b = 2 * tb * cp * 4                     # double-buffered f32 output
    tmp_b = rows * cp * (4 + 2 + 4 + 2)         # h1 f32 + h1 bf16 + h2 f32 + max-tree temps
    return x_b + w_b + sh_b + out_b + tmp_b


def _pick_tb(batch, s, dp, cp, *, budget_bytes, min_steps, x_buffers=3):
    """Pick a group tile targeting tb*s ~= 1024-2048 rows, >= min_steps grid
    steps (>= 2 per TensorCore), (8,128) tiling constraints, and a VMEM
    budget that also fits v7x."""

    def ok(tb):
        if batch % tb:
            return False
        if (tb * s) % 8 and tb != batch:
            return False
        if tb % 8 and tb != batch:
            return False
        return _need_bytes(tb, s, dp, cp, x_buffers) <= budget_bytes

    cands = [t for t in range(1, batch + 1) if ok(t)]
    if not cands:
        return batch  # last resort; caller asserts will catch violations

    multi = [t for t in cands if batch // t >= min_steps]
    pool = multi if multi else cands

    def score(t):
        rows = t * s
        in_range = 512 <= rows <= 2048
        return (0 if in_range else 1,           # prefer the measured sweet spot
                0 if rows % 16 == 0 else 1,     # clean bf16 sublane packing
                abs(rows - 1024),               # closest to ~1k rows
                -t)
    return min(pool, key=score)


def _local_op_kernel(x_ref, w1_ref, b1_ref, w2_ref, b2_ref, o_ref, *, tb, s):
    # x_ref: (tb*s, dp) bf16 -- tb groups, each with s point-feature rows.
    x = x_ref[...]
    # conv1 (1x1, bias-free, BN1 scale pre-folded into W1): bf16 MXU, f32 acc.
    h1 = jnp.dot(x, w1_ref[...], preferred_element_type=jnp.float32)
    h1 = jnp.maximum(h1 + b1_ref[...], 0.0)          # shift + ReLU in f32 (VPU)
    # conv2 (BN2 scale folded): cast LHS to bf16 for the MXU only; f32 acc.
    h2 = jnp.dot(h1.astype(jnp.bfloat16), w2_ref[...],
                 preferred_element_type=jnp.float32)
    h2 = jnp.maximum(h2 + b2_ref[...], 0.0)

    cp = h2.shape[-1]
    # Max-pool over the s positions of each group: pairwise max tree over
    # sublane-aligned slices (pure VPU, no relayout); the final cross-sublane
    # (XLU) reduce is always over <= 8 rows, for any s.
    m = h2.reshape(tb, s, cp)
    ns = s
    while ns > 8:
        p = max(8, _round_up(ns, 16) // 2)   # split point: multiple of 8, < ns
        top = jnp.maximum(m[:, :ns - p, :], m[:, p:ns, :])
        if ns - p == p:
            m = top
        else:
            m = jnp.concatenate([top, m[:, ns - p:p, :]], axis=1)
        ns = p
    o_ref[...] = jnp.max(m, axis=1).astype(o_ref.dtype)


def _make_x_spec(tb, s, dp, buffers):
    if buffers is not None:
        try:
            return pl.BlockSpec((tb * s, dp), lambda i: (i, 0),
                                pipeline_mode=pl.Buffered(buffers))
        except TypeError:
            pass
    return pl.BlockSpec((tb * s, dp), lambda i: (i, 0))


def local_op(x, w1, bn1, w2, bn2, *, tb=None):
    # layout: kernel input is row-major (b*n*s, dp) bf16 (feature dim last,
    #         lane-mapped, zero-padded to a multiple of 128); this is the
    #         transpose of the PyTorch (b*n, d, s) NCW conv layout.  Kernel
    #         output is (b*n, cp) lane-dense f32; the wrapper slices off the
    #         channel padding and returns (b, out_channels, n) like the module.
    b, n, s, d = x.shape
    c = w1.shape[1]

    # Fold eval-mode BatchNorm: scale goes into the conv weights, shift stays.
    # TODO(synk): training-mode BN (batch statistics) is not modeled; only
    # eval-mode BN (running stats) is folded.
    g1, be1, rm1, rv1, eps1 = bn1
    g2, be2, rm2, rv2, eps2 = bn2
    scale1 = g1 / jnp.sqrt(rv1 + eps1)
    shift1 = be1 - rm1 * scale1
    scale2 = g2 / jnp.sqrt(rv2 + eps2)
    shift2 = be2 - rm2 * scale2
    w1f = w1.astype(jnp.float32) * scale1[None, :]
    w2f = w2.astype(jnp.float32) * scale2[None, :]

    # Pad channel dims to multiples of 128 lanes.  Exact: padded weight rows /
    # cols and shifts are zero, so padded output channels are relu(0) == 0 and
    # get sliced off after the call.  For real PCT sizes (d, c in {128, 256})
    # these pads are no-ops.
    dp = _round_up(d, 128)
    cp = _round_up(c, 128)
    w1p = jnp.zeros((dp, cp), jnp.bfloat16).at[:d, :c].set(w1f.astype(jnp.bfloat16))
    w2p = jnp.zeros((cp, cp), jnp.bfloat16).at[:c, :c].set(w2f.astype(jnp.bfloat16))
    b1p = jnp.zeros((1, cp), jnp.float32).at[0, :c].set(shift1.astype(jnp.float32))
    b2p = jnp.zeros((1, cp), jnp.float32).at[0, :c].set(shift2.astype(jnp.float32))

    batch = b * n
    # x.permute(0,1,3,2).reshape(b*n, d, s) transposed back to (b*n, s, d)
    # is exactly x.reshape(b*n*s, d).  bf16 halves the dominant HBM read.
    x_rows = x.reshape(batch * s, d).astype(jnp.bfloat16)
    if dp != d:
        x_rows = jnp.pad(x_rows, ((0, 0), (0, dp - d)))

    vmem_cap, cores = _tpu_generation_params()
    vmem_limit = (36 << 20) if vmem_cap <= (64 << 20) else (48 << 20)
    budget = vmem_limit - (8 << 20)   # headroom for Mosaic internal scratch

    if tb is None:
        tb = _pick_tb(batch, s, dp, cp, budget_bytes=budget, min_steps=2 * cores)
    assert batch % tb == 0, "b*n must be divisible by the group tile tb"
    assert (tb * s) % 8 == 0 or tb == batch, \
        "x tile rows must be a multiple of 8 (sublanes)"
    assert tb % 8 == 0 or tb == batch, \
        "output tile rows must be a multiple of 8 (sublanes)"
    grid = batch // tb

    kernel = functools.partial(_local_op_kernel, tb=tb, s=s)
    out_shape = jax.ShapeDtypeStruct((batch, cp), jnp.float32)

    def run(x_buffers):
        # Weight / shift operands are grid-invariant (constant index_map);
        # Pallas fetches them once and they are tiny in bf16.
        return pl.pallas_call(
            kernel,
            out_shape=out_shape,
            grid_spec=pltpu.PrefetchScalarGridSpec(
                num_scalar_prefetch=0,
                grid=(grid,),
                in_specs=[
                    _make_x_spec(tb, s, dp, x_buffers),         # point rows (bf16)
                    pl.BlockSpec((dp, cp), lambda i: (0, 0)),   # W1*scale1 (bf16)
                    pl.BlockSpec((1, cp), lambda i: (0, 0)),    # bn1 shift (f32)
                    pl.BlockSpec((cp, cp), lambda i: (0, 0)),   # W2*scale2 (bf16)
                    pl.BlockSpec((1, cp), lambda i: (0, 0)),    # bn2 shift (f32)
                ],
                out_specs=pl.BlockSpec((tb, cp), lambda i: (i, 0)),
            ),
            compiler_params=pltpu.CompilerParams(
                dimension_semantics=("parallel",),
                vmem_limit_bytes=vmem_limit),
        )(x_rows, w1p, b1p, w2p, b2p)

    if grid >= 3:
        try:
            out = run(3)      # triple-buffer x to hide DMA jitter
        except Exception:
            out = run(None)   # fall back to default double-buffering
    else:
        out = run(None)

    # (b*n, cp) -> drop channel padding -> (b, n, c) -> (b, c, n)
    out = out[:, :c]
    return jnp.transpose(out.reshape(b, n, c), (0, 2, 1))


def local_op_reference(x, w1, bn1, w2, bn2):
    """Pure-JAX f32 reference mirroring the PyTorch forward (eval-mode BN)."""
    b, n, s, d = x.shape
    g1, be1, rm1, rv1, eps1 = bn1
    g2, be2, rm2, rv2, eps2 = bn2
    scale1 = g1 / jnp.sqrt(rv1 + eps1)
    shift1 = be1 - rm1 * scale1
    scale2 = g2 / jnp.sqrt(rv2 + eps2)
    shift2 = be2 - rm2 * scale2
    xr = x.reshape(b * n * s, d).astype(jnp.float32)
    h1 = jnp.maximum(xr @ w1 * scale1 + shift1, 0.0)
    h2 = jnp.maximum(h1 @ w2 * scale2 + shift2, 0.0)
    pooled = h2.reshape(b * n, s, -1).max(axis=1)
    return jnp.transpose(pooled.reshape(b, n, -1), (0, 2, 1))


if __name__ == "__main__":
    # Small shapes implied by the forward: x is (b, n, s, d), d == in_channels.
    b, n, s, d = 2, 8, 16, 32
    out_channels = 32

    key = jax.random.PRNGKey(0)
    kx, kw1, kw2, kg1, kb1, km1, kv1, kg2, kb2, km2, kv2 = jax.random.split(key, 11)

    x = jax.random.normal(kx, (b, n, s, d), dtype=jnp.float32)

    # Conv1d weights (out, in, 1) stored transposed as (in, out) for row matmul.
    w1 = 0.1 * jax.random.normal(kw1, (d, out_channels), dtype=jnp.float32)
    w2 = 0.1 * jax.random.normal(kw2, (out_channels, out_channels), dtype=jnp.float32)

    # Deterministic BatchNorm params / running stats (eval-mode BN).
    bn1 = (1.0 + 0.05 * jax.random.normal(kg1, (out_channels,), jnp.float32),
           0.05 * jax.random.normal(kb1, (out_channels,), jnp.float32),
           0.1 * jax.random.normal(km1, (out_channels,), jnp.float32),
           0.5 + jax.random.uniform(kv1, (out_channels,), jnp.float32),
           1e-5)
    bn2 = (1.0 + 0.05 * jax.random.normal(kg2, (out_channels,), jnp.float32),
           0.05 * jax.random.normal(kb2, (out_channels,), jnp.float32),
           0.1 * jax.random.normal(km2, (out_channels,), jnp.float32),
           0.5 + jax.random.uniform(kv2, (out_channels,), jnp.float32),
           1e-5)

    out = jax.block_until_ready(local_op(x, w1, bn1, w2, bn2))
    ref = jax.block_until_ready(local_op_reference(x, w1, bn1, w2, bn2))

    assert out.shape == (b, out_channels, n), out.shape
    # bf16 inputs / weights with f32 accumulation -> ~1e-2 relative error.
    assert jnp.allclose(out, ref, atol=3e-2, rtol=3e-2), "mismatch vs reference"
    print("KERNEL_OK")
</pallas_src>

<mosaic_0001>
module attributes {stable_mosaic.version = 11 : i64} {
  func.func @_local_op_kernel(%arg0: i32, %arg1: memref<128x128xbf16, #tpu.memory_space<vmem>>, %arg2: memref<128x128xbf16, #tpu.memory_space<vmem>>, %arg3: memref<1x128xf32, #tpu.memory_space<vmem>>, %arg4: memref<128x128xbf16, #tpu.memory_space<vmem>>, %arg5: memref<1x128xf32, #tpu.memory_space<vmem>>, %arg6: memref<8x128xf32, #tpu.memory_space<vmem>>) attributes {dimension_semantics = [#tpu.dimension_semantics<parallel>], iteration_bounds = array<i64: 2>, scalar_prefetch = 0 : i64, scratch_operands = 0 : i64, tpu.core_type = #tpu.core_type<tc>, window_params = [{transform_indices = @transform_0, window_bounds = array<i64: 128, 128>}, {pipeline_mode = #tpu.pipeline_mode<synchronous>, transform_indices = @transform_1, window_bounds = array<i64: 128, 128>}, {pipeline_mode = #tpu.pipeline_mode<synchronous>, transform_indices = @transform_2, window_bounds = array<i64: 1, 128>}, {pipeline_mode = #tpu.pipeline_mode<synchronous>, transform_indices = @transform_3, window_bounds = array<i64: 128, 128>}, {pipeline_mode = #tpu.pipeline_mode<synchronous>, transform_indices = @transform_4, window_bounds = array<i64: 1, 128>}, {transform_indices = @transform_5, window_bounds = array<i64: 8, 128>}]} {
    %c0 = arith.constant 0 : index
    %c0_0 = arith.constant 0 : index
    %0 = vector.load %arg1[%c0, %c0_0] : memref<128x128xbf16, #tpu.memory_space<vmem>>, vector<128x128xbf16>
    %c0_1 = arith.constant 0 : index
    %c0_2 = arith.constant 0 : index
    %1 = vector.load %arg2[%c0_1, %c0_2] : memref<128x128xbf16, #tpu.memory_space<vmem>>, vector<128x128xbf16>
    %cst = arith.constant dense<0.000000e+00> : vector<128x128xf32>
    %2 = tpu.matmul %0, %1, %cst {dimension_numbers = #tpu.dot_dimension_numbers<[1], [0], [0], [1], [0, 0, 1, 1], [], []>} : vector<128x128xbf16>, vector<128x128xbf16>, vector<128x128xf32> -> vector<128x128xf32>
    %c0_3 = arith.constant 0 : index
    %c0_4 = arith.constant 0 : index
    %3 = vector.load %arg3[%c0_3, %c0_4] : memref<1x128xf32, #tpu.memory_space<vmem>>, vector<1x128xf32>
    %4 = vector.broadcast %3 : vector<1x128xf32> to vector<128x128xf32>
    %5 = arith.addf %2, %4 : vector<128x128xf32>
    %cst_5 = arith.constant 0.000000e+00 : f32
    %6 = vector.broadcast %cst_5 : f32 to vector<128x128xf32>
    %7 = arith.maximumf %5, %6 : vector<128x128xf32>
    %8 = arith.truncf %7 : vector<128x128xf32> to vector<128x128xbf16>
    %c0_6 = arith.constant 0 : index
    %c0_7 = arith.constant 0 : index
    %9 = vector.load %arg4[%c0_6, %c0_7] : memref<128x128xbf16, #tpu.memory_space<vmem>>, vector<128x128xbf16>
    %cst_8 = arith.constant dense<0.000000e+00> : vector<128x128xf32>
    %10 = tpu.matmul %8, %9, %cst_8 {dimension_numbers = #tpu.dot_dimension_numbers<[1], [0], [0], [1], [0, 0, 1, 1], [], []>} : vector<128x128xbf16>, vector<128x128xbf16>, vector<128x128xf32> -> vector<128x128xf32>
    %c0_9 = arith.constant 0 : index
    %c0_10 = arith.constant 0 : index
    %11 = vector.load %arg5[%c0_9, %c0_10] : memref<1x128xf32, #tpu.memory_space<vmem>>, vector<1x128xf32>
    %12 = vector.broadcast %11 : vector<1x128xf32> to vector<128x128xf32>
    %13 = arith.addf %10, %12 : vector<128x128xf32>
    %cst_11 = arith.constant 0.000000e+00 : f32
    %14 = vector.broadcast %cst_11 : f32 to vector<128x128xf32>
    %15 = arith.maximumf %13, %14 : vector<128x128xf32>
    %16 = vector.shape_cast %15 : vector<128x128xf32> to vector<8x16x128xf32>
    %17 = vector.extract_strided_slice %16 {offsets = [0, 0, 0], sizes = [8, 8, 128], strides = [1, 1, 1]} : vector<8x16x128xf32> to vector<8x8x128xf32>
    %18 = vector.extract_strided_slice %16 {offsets = [0, 8, 0], sizes = [8, 8, 128], strides = [1, 1, 1]} : vector<8x16x128xf32> to vector<8x8x128xf32>
    %19 = arith.maximumf %17, %18 : vector<8x8x128xf32>
    %cst_12 = arith.constant dense<0xFF800000> : vector<8x128xf32>
    %20 = vector.multi_reduction <maximumf>, %19, %cst_12 [1] : vector<8x8x128xf32> to vector<8x128xf32>
    %c0_13 = arith.constant 0 : index
    %c0_14 = arith.constant 0 : index
    %21 = vector.load %arg6[%c0_13, %c0_14] : memref<8x128xf32, #tpu.memory_space<vmem>>, vector<8x128xf32>
    tpu.vector_store %arg6[%c0_13, %c0_14], %20 {strides = array<i32>} : memref<8x128xf32, #tpu.memory_space<vmem>>, vector<8x128xf32>,
    return
  }
  func.func @transform_0(%arg0: i32) -> (i32, i32) {
    %c0_i32 = arith.constant 0 : i32
    %c0_i32_0 = arith.constant 0 : i32
    return %arg0, %c0_i32 : i32, i32
  }
  func.func @transform_1(%arg0: i32) -> (i32, i32) {
    %c0_i32 = arith.constant 0 : i32
    %c0_i32_0 = arith.constant 0 : i32
    %c0_i32_1 = arith.constant 0 : i32
    return %c0_i32, %c0_i32_0 : i32, i32
  }
  func.func @transform_2(%arg0: i32) -> (i32, i32) {
    %c0_i32 = arith.constant 0 : i32
    %c0_i32_0 = arith.constant 0 : i32
    %c0_i32_1 = arith.constant 0 : i32
    return %c0_i32, %c0_i32_0 : i32, i32
  }
  func.func @transform_3(%arg0: i32) -> (i32, i32) {
    %c0_i32 = arith.constant 0 : i32
    %c0_i32_0 = arith.constant 0 : i32
    %c0_i32_1 = arith.constant 0 : i32
    return %c0_i32, %c0_i32_0 : i32, i32
  }
  func.func @transform_4(%arg0: i32) -> (i32, i32) {
    %c0_i32 = arith.constant 0 : i32
    %c0_i32_0 = arith.constant 0 : i32
    %c0_i32_1 = arith.constant 0 : i32
    return %c0_i32, %c0_i32_0 : i32, i32
  }
  func.func @transform_5(%arg0: i32) -> (i32, i32) {
    %c0_i32 = arith.constant 0 : i32
    %c0_i32_0 = arith.constant 0 : i32
    return %arg0, %c0_i32 : i32, i32
  }
}

</mosaic_0001>

<bundles_post_ra>
// kernel: tpu_custom_call.1
= control target key start
LH: loop header
LB: loop body
LE: loop exit
PB: predicated region body
PF: predicated region fallthrough
CT: control target
= control target key end

     0   :  { %10 = vsyncpa [#allocation3], 0  ;;  %s1600_s0 = inlined_call_operand.hbm [shape: bf16[256,128], index: 0, kind: input, shape index: {}]   ;;  %s1601_s1 = inlined_call_operand.hbm [shape: bf16[128,128], index: 1, kind: input, shape index: {}]   ;;  %s1602_s2 = inlined_call_operand.vmem [shape: f32[1,128], index: 2, kind: input, shape index: {}]   ;;  %s1603_s3 = inlined_call_operand.hbm [shape: bf16[128,128], index: 3, kind: input, shape index: {}]   ;;  %s1604_s4 = inlined_call_operand.vmem [shape: f32[1,128], index: 4, kind: input, shape index: {}]   ;;  %s1605_s5 = inlined_call_operand.hbm [shape: f32[16,128], index: 5, kind: output, shape index: {}]  }
   0x1   :  { %12 = vsyncpa [#allocation3 + $0x1], 0 }
   0x2   :  { %13 = vsyncpa [#allocation6], 0 }
   0x3   :  { %14 = vsyncpa [#allocation4], 0 }
   0x4   :  { %16 = vsyncpa [#allocation4 + $0x1], 0  ;;  %s1324_s18 = smov 0   ;;  %s1326_s19 = smov 0  }
   0x5   :  { %s1328_s20 = smov 0   ;;  %s1330_s21 = smov 0  }
   0x6 LB: > { %s1345_s22 = sadd.s32 4294967295, %s1286_s21   ;;  %s897_s23 = sadd.s32 4294967294, %s1286_s21   ;;  %s1286_s21 = sphi %s1330_s21, %s1625_s21   ;;  %s1282_s20 = sphi %s1328_s20, %s1624_s20   ;;  %s1278_s19 = sphi %s1326_s19, %s1623_s19   ;;  %s1274_s18 = sphi %s1324_s18, %s1622_s18  }
   0x7   : > { %p42_p0 = scmp.ne.s32.totalorder %s1278_s19, %s1274_s18  ;;  %p1606_p1 = scmp.eq.s32.totalorder %s1345_s22, 0 }
   0x8   : > { %p156_p3 = scmp.eq.s32.totalorder %s897_s23, 1  ;;  %p898_p5 = scmp.ge.s32.totalorder %s1286_s21, 1 }
   0x9   : > { %p1354_p4 = por %p1606_p1, %p42_p0  ;;  %p163_p7 = scmp.lt.s32.totalorder %s1286_s21, 3 }
   0xa   : > { %p1359_p6 = por %p156_p3, %p42_p0  ;;  %s1288_s27 = smov [#allocation5]  }
   0xb   : > { %s1609_s24 = scalar_select %p1354_p4, 1, 0 }
   0xc   : > { %s1610_s25 = scalar_select %p1359_p6, 1, 0 }
   0xd   : > { %p1364_p8 = pnand %p898_p5, %p163_p7  ;;  %s175_s28 = sshll.u32 %s1288_s27, 4  ;;  %s1368_s28 = int_to_ptr.vmem [resolvable:$true] %s175_s28 }
   0xe   : > { %s1289_s30 = smov [#allocation7]   ;;  %s1130_s9 = scalar_lea.hbm %s1601_s1, 1024 }
   0xf   : > { %p1049_p9 = pneg %p1364_p8  ;;  %s191_s6 = sshll.u32 %s1289_s30, 4  ;;  %s1379_s6 = int_to_ptr.vmem [resolvable:$true] %s191_s6 }
  0x10   : > { %p1131_p12 = scmp.ne.s32.totalorder %s1601_s1, %s1130_s9  ;;  %p1137_p5 = scmp.lt.u32.totalorder %s1130_s9, %s1601_s1 }
  0x11   : > { %p1375_p11 = pnand %p1049_p9, %p1606_p1 }
  0x13   : > { %p1132_p13 = pneg %p1375_p11 }
  0x15   : > { %p1133_p0 = pnand %p1132_p13, %p1131_p12 }
  0x17   : > { %p1134_p3 = pneg %p1133_p0 }
  0x19   : > { %p1139_p7 = pnand %p1137_p5, %p1134_p3 }
  0x1b   : > { %1142 = shalt.err (!%p1139_p7)
}
  0x1c   : > { %s1143_s14 = scalar_lea.vmem %s1368_s28, 1024  ;;  %p1151_p2 = scmp.lt.s32.totalorder %s1368_s28, %s1368_s28 }
  0x1d   : > { %p1144_p9 = scmp.ne.s32.totalorder %s1368_s28, %s1143_s14  ;;  %p1152_p12 = scmp.lt.s32.totalorder %s1143_s14, %s1143_s14 }
  0x1f   : > { %p1146_p10 = pnand %p1144_p9, %p1132_p13  ;;  %p1153_p0 = por %p1152_p12, %p1151_p2 }
  0x21   : > { %p1147_p1 = pneg %p1146_p10 }
  0x23   : > { %p1154_p6 = pnand %p1153_p0, %p1147_p1 }
  0x25   : > { %1157 = shalt.err (!%p1154_p6)
}
  0x26   : > { %s1290_s15 = smov 64   ;;  %s1291_s16 = smov 4  }
  0x27   : > { %1052 = dma.hbm_to_vmem [thread:$0]  (!%p1375_p11), %s1601_s1, 1024, %s1368_s28, [#allocation6], %s1290_s15, %s1290_s15, %s1291_s16  }
  0x28   : > { %s1158_s7 = scalar_lea.hbm %s1603_s3, 1024 }
  0x29   : > { %p1159_p1 = scmp.ne.s32.totalorder %s1603_s3, %s1158_s7  ;;  %p1165_p10 = scmp.lt.u32.totalorder %s1158_s7, %s1603_s3 }
  0x2b   : > { %p1161_p2 = pnand %p1159_p1, %p1132_p13 }
  0x2d   : > { %p1162_p6 = pneg %p1161_p2 }
  0x2f   : > { %p1167_p3 = pnand %p1165_p10, %p1162_p6 }
  0x31   : > { %1170 = shalt.err (!%p1167_p3)
}
  0x32   : > { %s1171_s28 = scalar_lea.vmem %s1379_s6, 1024  ;;  %p1179_p12 = scmp.lt.s32.totalorder %s1379_s6, %s1379_s6 }
  0x33   : > { %p1172_p5 = scmp.ne.s32.totalorder %s1379_s6, %s1171_s28  ;;  %p1180_p0 = scmp.lt.s32.totalorder %s1171_s28, %s1171_s28 }
  0x35   : > { %p1174_p7 = pnand %p1172_p5, %p1132_p13  ;;  %p1181_p1 = por %p1180_p0, %p1179_p12 }
  0x37   : > { %p1175_p9 = pneg %p1174_p7 }
  0x39   : > { %p1182_p2 = pnand %p1181_p1, %p1175_p9 }
  0x3b   : > { %1185 = shalt.err (!%p1182_p2)
}
  0x3c   : > { %1055 = dma.hbm_to_vmem [thread:$0]  (!%p1375_p11), %s1603_s3, 1024, %s1379_s6, [#allocation6], %s1290_s15, %s1290_s15, %s1291_s16  }
  0x3d   : > { %s1440_s29 = sadd.s32 1, %s1286_s21   ;;  %s29_s14 = sadd.s32 1, %s1282_s20 }
  0x3e   : > { %s26_s17 = ssub.s32 %s1286_s21, %s1440_s29  ;;  %p36_p13 = scmp.ne.s32.totalorder %s1282_s20, %s1278_s19 }
  0x3f   : > { %p27_p6 = scmp.eq.s32.totalorder %s26_s17, 0  ;;  %p37_p10 = scmp.eq.s32.totalorder %s1286_s21, 0 }
  0x40   : > { %p1613_p3 = scmp.eq.s32.totalorder %s1345_s22, 1  ;;  %p1066_p7 = scmp.lt.s32.totalorder %s1286_s21, 2 }
  0x41   : > { %s1456_s27 = scalar_select %p27_p6, %s1282_s20, %s29_s14  }
  0x42   : > { %p1450_p5 = por %p1613_p3, %p36_p13  ;;  %p38_p9 = por %p37_p10, %p36_p13 }
  0x43   : > { %s208_s30 = sand.u32 1, %s1282_s20   ;;  %s940_s6 = sshll.u32 %s1286_s21, 10 }
  0x44   : > { %s1614_s23 = scalar_select %p1450_p5, 1, 0 }
  0x45   : > { %s902_s7 = sshll.u32 %s208_s30, 6  ;;  %s1463_s10 = scalar_lea.hbm %s1600_s0, %s940_s6 }
  0x46   : > { %s212_s11 = scalar_lea.vmem [#allocation2], %s902_s7  ;;  %p1467_p11 = pnand %p1066_p7, %p38_p9 }
  0x47   : > { %s219_s28 = sshll.u32 %s212_s11, 4  ;;  %s1471_s13 = scalar_lea.sflag [#allocation3], %s208_s30  ;;  %s1465_s28 = int_to_ptr.vmem [resolvable:$true] %s219_s28 }
  0x48   : > { %s1186_s14 = scalar_lea.hbm %s1463_s10, 1024  ;;  %p1188_p0 = pneg %p1467_p11 }
  0x49   : > { %p1187_p12 = scmp.ne.s32.totalorder %s1463_s10, %s1186_s14  ;;  %s1191_s6 = scalar_lea.hbm %s1600_s0, 2048 }
  0x4a   : > { %p1192_p13 = scmp.lt.u32.totalorder %s1463_s10, %s1600_s0  ;;  %p1193_p6 = scmp.lt.u32.totalorder %s1191_s6, %s1186_s14 }
  0x4b   : > { %p1189_p1 = pnand %p1188_p0, %p1187_p12  ;;  %p1195_p3 = scmp.lt.u32.totalorder %s1186_s14, %s1463_s10 }
  0x4c   : > { %p1194_p10 = por %p1193_p6, %p1192_p13 }
  0x4d   : > { %p1190_p2 = pneg %p1189_p1 }
  0x4e   : > { %p1196_p7 = por %p1195_p3, %p1194_p10 }
  0x50   : > { %p1197_p9 = pnand %p1196_p7, %p1190_p2 }
  0x52   : > { %1200 = shalt.err (!%p1197_p9)
}
  0x53   : > { %s1201_s30 = scalar_lea.vmem %s1465_s28, 1024  ;;  %s1292_s11 = smov [#allocation2]  }
  0x54   : > { %p1202_p12 = scmp.ne.s32.totalorder %s1465_s28, %s1201_s30  ;;  %s1206_s17 = sshll.u32 %s1292_s11, 4  ;;  %s1207_s17 = int_to_ptr.vmem [resolvable:$false] %s1206_s17 }
  0x55   : > { %s1208_s7 = scalar_lea.vmem %s1207_s17, 2048  ;;  %p1209_p4 = scmp.lt.s32.totalorder %s1465_s28, %s1207_s17 }
  0x56   : > { %p1204_p1 = pnand %p1202_p12, %p1188_p0  ;;  %p1210_p13 = scmp.lt.s32.totalorder %s1208_s7, %s1201_s30 }
  0x58   : > { %p1205_p5 = pneg %p1204_p1  ;;  %p1211_p6 = por %p1210_p13, %p1209_p4 }
  0x5a   : > { %p1212_p10 = pnand %p1211_p6, %p1205_p5 }
  0x5c   : > { %1215 = shalt.err (!%p1212_p10)
}
  0x5d   : > { %1059 = dma.hbm_to_vmem [thread:$0]  (!%p1467_p11), %s1463_s10, 1024, %s1465_s28, %s1471_s13, %s1290_s15, %s1290_s15, %s1291_s16  }
  0x5e   : > { %231 = sbr.rel (%p1364_p8) target bundleno = 633 (0x279), region = 40  ;;  %s1505_s14 = sand.u32 (!%p1364_p8), 1, %s1278_s19  }
  0x5f   : > { %s906_s6 = sshll.u32 (!%p1364_p8), %s1505_s14, 6  ;;  %s234_s8 = scalar_lea.sflag (!%p1364_p8), [#allocation3], %s1505_s14 }
  0x60   : > { %s1509_s9 = scalar_lea.vmem (!%p1364_p8), [#allocation2], %s906_s6  ;;  %p1616_p4 = scmp.ne.s32.totalorder (!%p1364_p8), %s1609_s24, 0 }
  0x65   : > { %1261 = dma.done.wait (%p1616_p4), %s234_s8, 1024  }
  0x66   : > { %1263 = vsyncadd (%p1616_p4), %s234_s8, 4294966272  ;;  %p1617_p5 = scmp.eq.s32.totalorder %s1345_s22, 0 }
  0x68   : > { %1265 = dma.done.wait (%p1617_p5), [#allocation6], 2048   ;;  %p1618_p8 = pmov %p1617_p5 }
  0x69   : > { %v1106_v0 = vld [vmem:[#allocation5] sm:$0xff]   ;;  %v1107_v1 = vld [vmem:[#allocation5 + $0x8] sm:$0xff]   ;;  %v1108_v2 = vld [vmem:[#allocation5 + $0x10] sm:$0xff]   ;;  %vm778_vm0 = vcmask 1041409   ;;  %vm780_vm1 = vcmask 1042434   ;;  %vm782_vm2 = vcmask 1043459  }
  0x6a   : > { %1267 = vsyncadd (%p1618_p8), [#allocation6], 4294965248  ;;  %973 = vmatprep.subr.bf16.mxu0 %v1106_v0  ;;  %v1109_v3 = vld [vmem:[#allocation5 + $0x18] sm:$0xff]   ;;  %v1114_v4 = vld [vmem:[%s1509_s9] sm:$0xff]   ;;  %vm784_vm3 = vcmask 1044484   ;;  %vm786_vm4 = vcmask 1045509  }
  0x6b   : > { %974 = vmatpush3.bf16.msra.mxu0 %v1106_v0  ;;  %989 = vmatprep.mubr.bf16.mxu0 %v1114_v4  ;;  %v1110_v5 = vld [vmem:[#allocation5 + $0x20] sm:$0xff]   ;;  %v1111_v6 = vld [vmem:[#allocation5 + $0x28] sm:$0xff]   ;;  %v1112_v9 = vld [vmem:[#allocation5 + $0x30] sm:$0xff]   ;;  %s909_s10 = sshll.u32 %s1505_s14, 3  ;;  %vm788_vm5 = vcmask 1046534   ;;  %s937_s28 = sshll.u32 %s1345_s22, 7 }
  0x6c   : > { %975 = vmatprep.subr.bf16.mxu0 %v1107_v1  ;;  %v1122_v7 = vld [vmem:[#allocation7] sm:$0xff]   ;;  %v1123_v8 = vld [vmem:[#allocation7 + $0x8] sm:$0xff]   ;;  %v1124_v10 = vld [vmem:[#allocation7 + $0x10] sm:$0xff]   ;;  %s271_s12 = scalar_lea.vmem [#allocation8], %s909_s10  ;;  %vm790_vm6 = vcmask 1047559   ;;  %s1556_s17 = scalar_lea.hbm %s1605_s5, %s937_s28 }
  0x6d   : > { %1005 = vmatprep.subr.bf16.mxu1 %v1122_v7  ;;  %v1113_v11 = vld [vmem:[#allocation5 + $0x38] sm:$0xff]   ;;  %v1126_v13 = vld [vmem:[#allocation7 + $0x20] sm:$0xff]   ;;  %v1115_v14 = vld [vmem:[%s1509_s9 + $0x8] sm:$0xff]   ;;  %s808_s13 = sshll.u32 %s271_s12, 4  ;;  %s795_s7 = scalar_lea.sflag [#allocation4], %s1505_s14  ;;  %s1558_s13 = int_to_ptr.vmem [resolvable:$true] %s808_s13 }
  0x6e   : > { %1006 = vmatpush3.bf16.msra.mxu1 %v1122_v7  ;;  %v1125_v12 = vld [vmem:[#allocation7 + $0x18] sm:$0xff]   ;;  %v1116_v15 = vld [vmem:[%s1509_s9 + $0x10] sm:$0xff]   ;;  %v1127_v16 = vld [vmem:[#allocation7 + $0x28] sm:$0xff]   ;;  %s1216_s22 = scalar_lea.vmem %s1558_s13, 128  ;;  %p1619_p0 = scmp.ne.s32.totalorder %s1614_s23, 0 }
  0x6f   : > { %976 = vmatpush3.bf16.msra.mxu0 %v1107_v1  ;;  %1007 = vmatprep.subr.bf16.mxu1 %v1123_v8  ;;  %v1117_v17 = vld [vmem:[%s1509_s9 + $0x18] sm:$0xff]   ;;  %v1118_v18 = vld [vmem:[%s1509_s9 + $0x20] sm:$0xff]   ;;  %v1119_v19 = vld [vmem:[%s1509_s9 + $0x28] sm:$0xff]   ;;  %p1217_p11 = scmp.ne.s32.totalorder %s1558_s13, %s1216_s22  ;;  %s1293_s6 = smov [#allocation8]  }
  0x70   : > { %977 = vmatprep.subr.bf16.mxu0 %v1108_v2  ;;  %v1120_v20 = vld [vmem:[%s1509_s9 + $0x30] sm:$0xff]   ;;  %v1121_v21 = vld [vmem:[%s1509_s9 + $0x38] sm:$0xff]   ;;  %v910_v24 = vld [vmem:[%s1602_s2] ss:$0 sm:$0xff]  ;;  %s1220_s8 = sshll.u32 %s1293_s6, 4  ;;  %s1221_s8 = int_to_ptr.vmem [resolvable:$false] %s1220_s8 }
  0x71   : > { %v1128_v22 = vld [vmem:[#allocation7 + $0x30] sm:$0xff]   ;;  %v1129_v23 = vld [vmem:[#allocation7 + $0x38] sm:$0xff]   ;;  %p1218_p2 = pnand %p1217_p11, %p1619_p0  ;;  %s1222_s9 = scalar_lea.vmem %s1221_s8, 256 }
  0x72   : > { %1008 = vmatpush3.bf16.msra.mxu1 %v1123_v8  ;;  %p1223_p7 = scmp.lt.s32.totalorder %s1558_s13, %s1221_s8  ;;  %p1224_p9 = scmp.lt.s32.totalorder %s1222_s9, %s1216_s22 }
  0x73   : > { %978 = vmatpush3.bf16.msra.mxu0 %v1108_v2  ;;  %1009 = vmatprep.subr.bf16.mxu1 %v1124_v10  ;;  %p1219_p3 = pneg %p1218_p2 }
  0x74   : > { %979 = vmatprep.subr.bf16.mxu0 %v1109_v3  ;;  %p1225_p12 = por %p1224_p9, %p1223_p7 }
  0x76   : > { %1010 = vmatpush3.bf16.msra.mxu1 %v1124_v10  ;;  %p1226_p1 = pnand %p1225_p12, %p1219_p3 }
  0x77   : > { %980 = vmatpush3.bf16.msra.mxu0 %v1109_v3  ;;  %1011 = vmatprep.subr.bf16.mxu1 %v1125_v12 }
  0x78   : > { %981 = vmatprep.subr.bf16.mxu0 %v1110_v5 }
  0x7a   : > { %1012 = vmatpush3.bf16.msra.mxu1 %v1125_v12 }
  0x7b   : > { %982 = vmatpush3.bf16.msra.mxu0 %v1110_v5  ;;  %1013 = vmatprep.subr.bf16.mxu1 %v1126_v13 }
  0x7c   : > { %983 = vmatprep.subr.bf16.mxu0 %v1111_v6 }
  0x7e   : > { %1014 = vmatpush3.bf16.msra.mxu1 %v1126_v13 }
  0x7f   : > { %984 = vmatpush3.bf16.msra.mxu0 %v1111_v6  ;;  %1015 = vmatprep.subr.bf16.mxu1 %v1127_v16 }
  0x80   : > { %985 = vmatprep.subr.bf16.mxu0 %v1112_v9 }
  0x82   : > { %1016 = vmatpush3.bf16.msra.mxu1 %v1127_v16 }
  0x83   : > { %986 = vmatpush3.bf16.msra.mxu0 %v1112_v9  ;;  %1017 = vmatprep.subr.bf16.mxu1 %v1128_v22 }
  0x84   : > { %987 = vmatprep.subr.bf16.mxu0 %v1113_v11 }
  0x86   : > { %1018 = vmatpush3.bf16.msra.mxu1 %v1128_v22 }
  0x87   : > { %988 = vmatpush3.bf16.msra.mxu0 %v1113_v11  ;;  %1019 = vmatprep.subr.bf16.mxu1 %v1129_v23 }
  0x8a   : > { %990 = vmatmul.mubr.bf16.vlgmr.msra.gmra.mrb[0].mxu0 %v1115_v14  ;;  %1020 = vmatpush3.bf16.msra.mxu1 %v1129_v23 }
  0x8b   : > { %993 = vmatprep.mubr.bf16.mxu0 %v1116_v15 }
  0x92   : > { %994 = vmatmul.mubr.bf16.gmra.mrb[4].mxu0 %v1117_v17  ;;  %v1533_v17 = vld [vmem:[%s1604_s4] ss:$0 sm:$0xff] }
  0x93   : > { %997 = vmatprep.mubr.bf16.mxu0 %v1118_v18 }
  0x9a   : > { %998 = vmatmul.mubr.bf16.gmra.mrb[8].mxu0 %v1119_v19 }
  0x9b   : > { %1001 = vmatprep.mubr.bf16.mxu0 %v1120_v20 }
  0xa2   : > { %1002 = vmatmul.mubr.bf16.gmra.mrb[12].mxu0 %v1121_v21 }
 0x15d   : > { %v991_v25 = vpop.f32.mrb[0].mxu0 }
 0x15e   : > { %v452_v26 = vadd.f32 %v991_v25, %v910_v24  ;;  %v443_v27 = vpop.f32.mrb[1].mxu0 }
 0x15f   : > { %v444_v28 = vadd.f32 %v910_v24, %v443_v27  ;;  %v992_v29 = vpop.f32.mrb[2].mxu0 }
 0x160   : > { %v455_v30 = vadd.f32 %v992_v29, %v910_v24  ;;  %v446_v31 = vpop.f32.mrb[3].mxu0  ;;  %v508_v33 = vmax.f32 %v452_v26, 0.0 }
 0x161   : > { %v447_v32 = vadd.f32 %v910_v24, %v446_v31  ;;  %v506_v35 = vmax.f32 %v444_v28, 0.0 }
 0x162   : > { %v509_v34 = vmax.f32 %v455_v30, 0.0 }
 0x163   : > { %v507_v36 = vmax.f32 %v447_v32, 0.0 }
 0x164   : > { %v523_v37 = vpack.c.bf16 %v509_v34, %v508_v33 }
 0x165   : > { %v995_v38 = vpop.f32.mrb[4].mxu0  ;;  %v522_v39 = vpack.c.bf16 %v507_v36, %v506_v35 }
 0x166   : > { %v468_v40 = vadd.f32 %v995_v38, %v910_v24  ;;  %v459_v41 = vpop.f32.mrb[5].mxu0 }
 0x167   : > { %v460_v42 = vadd.f32 %v910_v24, %v459_v41  ;;  %v996_v43 = vpop.f32.mrb[6].mxu0  ;;  %1021 = vmatprep.mubr.bf16.mxu1 %v522_v39 }
 0x168   : > { %v471_v44 = vadd.f32 %v996_v43, %v910_v24  ;;  %v462_v45 = vpop.f32.mrb[7].mxu0  ;;  %1022 = vmatmul.mubr.bf16.vlgmr.msra.gmra.mrb[0].mxu1 %v523_v37  ;;  %v512_v47 = vmax.f32 %v468_v40, 0.0 }
 0x169   : > { %v463_v46 = vadd.f32 %v910_v24, %v462_v45  ;;  %v510_v49 = vmax.f32 %v460_v42, 0.0 }
 0x16a   : > { %v513_v48 = vmax.f32 %v471_v44, 0.0 }
 0x16b   : > { %v511_v50 = vmax.f32 %v463_v46, 0.0 }
 0x16c   : > { %v525_v51 = vpack.c.bf16 %v513_v48, %v512_v47 }
 0x16d   : > { %v524_v52 = vpack.c.bf16 %v511_v50, %v510_v49  ;;  %v999_v53 = vpop.f32.mrb[8].mxu0 }
 0x16e   : > { %v484_v54 = vadd.f32 %v999_v53, %v910_v24  ;;  %v475_v55 = vpop.f32.mrb[9].mxu0 }
 0x16f   : > { %v476_v56 = vadd.f32 %v910_v24, %v475_v55  ;;  %v1000_v57 = vpop.f32.mrb[10].mxu0  ;;  %1025 = vmatprep.mubr.bf16.mxu1 %v524_v52 }
 0x170   : > { %v487_v58 = vadd.f32 %v1000_v57, %v910_v24  ;;  %v478_v59 = vpop.f32.mrb[11].mxu0  ;;  %1026 = vmatmul.mubr.bf16.gmra.mrb[4].mxu1 %v525_v51  ;;  %v516_v61 = vmax.f32 %v484_v54, 0.0 }
 0x171   : > { %v479_v60 = vadd.f32 %v910_v24, %v478_v59  ;;  %v514_v63 = vmax.f32 %v476_v56, 0.0 }
 0x172   : > { %v517_v62 = vmax.f32 %v487_v58, 0.0 }
 0x173   : > { %v515_v0 = vmax.f32 %v479_v60, 0.0 }
 0x174   : > { %v527_v1 = vpack.c.bf16 %v517_v62, %v516_v61 }
 0x175   : > { %v526_v2 = vpack.c.bf16 %v515_v0, %v514_v63  ;;  %v1003_v3 = vpop.f32.mrb[12].mxu0 }
 0x176   : > { %v500_v4 = vadd.f32 %v1003_v3, %v910_v24  ;;  %v491_v5 = vpop.f32.mrb[13].mxu0 }
 0x177   : > { %v492_v6 = vadd.f32 %v910_v24, %v491_v5  ;;  %v1004_v7 = vpop.f32.mrb[14].mxu0  ;;  %1029 = vmatprep.mubr.bf16.mxu1 %v526_v2 }
 0x178   : > { %v503_v8 = vadd.f32 %v1004_v7, %v910_v24  ;;  %v494_v9 = vpop.f32.mrb[15].mxu0  ;;  %1030 = vmatmul.mubr.bf16.gmra.mrb[8].mxu1 %v527_v1  ;;  %v520_v11 = vmax.f32 %v500_v4, 0.0 }
 0x179   : > { %v495_v10 = vadd.f32 %v910_v24, %v494_v9  ;;  %v518_v13 = vmax.f32 %v492_v6, 0.0 }
 0x17a   : > { %v521_v12 = vmax.f32 %v503_v8, 0.0 }
 0x17b   : > { %v519_v14 = vmax.f32 %v495_v10, 0.0 }
 0x17c   : > { %v529_v15 = vpack.c.bf16 %v521_v12, %v520_v11 }
 0x17d   : > { %v528_v16 = vpack.c.bf16 %v519_v14, %v518_v13 }
 0x17f   : > { %1033 = vmatprep.mubr.bf16.mxu1 %v528_v16 }
 0x180   : > { %1034 = vmatmul.mubr.bf16.gmra.mrb[12].mxu1 %v529_v15 }
 0x23b   : > { %v1023_v18 = vpop.f32.mrb[0].mxu1 }
 0x23c   : > { %v644_v19 = vadd.f32 %v1023_v18, %v1533_v17  ;;  %v635_v20 = vpop.f32.mrb[1].mxu1 }
 0x23d   : > { %v636_v21 = vadd.f32 %v1533_v17, %v635_v20  ;;  %v1024_v22 = vpop.f32.mrb[2].mxu1 }
 0x23e   : > { %v647_v23 = vadd.f32 %v1024_v22, %v1533_v17  ;;  %v638_v24 = vpop.f32.mrb[3].mxu1  ;;  %v700_v26 = vmax.f32 %v644_v19, 0.0 }
 0x23f   : > { %v639_v25 = vadd.f32 %v1533_v17, %v638_v24  ;;  %v698_v28 = vmax.f32 %v636_v21, 0.0 }
 0x240   : > { %v701_v27 = vmax.f32 %v647_v23, 0.0 }
 0x241   : > { %v699_v29 = vmax.f32 %v639_v25, 0.0 }
 0x242   : > { %v715_v30 = vmax.f32 %v700_v26, %v701_v27 }
 0x243   : > { %v714_v31 = vmax.f32 %v698_v28, %v699_v29  ;;  %v1027_v32 = vpop.f32.mrb[4].mxu1 }
 0x244   : > { %v728_v33 = vrot.slane %v715_v30, 4  ;;  %v660_v34 = vadd.f32 %v1027_v32, %v1533_v17  ;;  %v651_v35 = vpop.f32.mrb[5].mxu1 }
 0x245   : > { %v722_v36 = vrot.slane %v714_v31, 4  ;;  %v652_v37 = vadd.f32 %v1533_v17, %v651_v35  ;;  %v1028_v38 = vpop.f32.mrb[6].mxu1 }
 0x246   : > { %v729_v39 = vmax.f32 %v715_v30, %v728_v33  ;;  %v663_v40 = vadd.f32 %v1028_v38, %v1533_v17  ;;  %v654_v41 = vpop.f32.mrb[7].mxu1  ;;  %v704_v45 = vmax.f32 %v660_v34, 0.0 }
 0x247   : > { %v723_v42 = vmax.f32 %v714_v31, %v722_v36  ;;  %v655_v43 = vadd.f32 %v1533_v17, %v654_v41  ;;  %v702_v48 = vmax.f32 %v652_v37, 0.0 }
 0x248   : > { %v730_v44 = vrot.slane %v729_v39, 2  ;;  %v705_v46 = vmax.f32 %v663_v40, 0.0 }
 0x249   : > { %v724_v47 = vrot.slane %v723_v42, 2  ;;  %v703_v49 = vmax.f32 %v655_v43, 0.0 }
 0x24a   : > { %v731_v50 = vmax.f32 %v729_v39, %v730_v44  ;;  %v717_v51 = vmax.f32 %v704_v45, %v705_v46 }
 0x24b   : > { %v725_v52 = vmax.f32 %v723_v42, %v724_v47  ;;  %v716_v53 = vmax.f32 %v702_v48, %v703_v49  ;;  %v1031_v54 = vpop.f32.mrb[8].mxu1 }
 0x24c   : > { %v732_v55 = vrot.slane %v731_v50, 1  ;;  %v740_v56 = vrot.slane %v717_v51, 4  ;;  %v676_v57 = vadd.f32 %v1031_v54, %v1533_v17  ;;  %v667_v58 = vpop.f32.mrb[9].mxu1 }
 0x24d   : > { %v726_v59 = vrot.slane %v725_v52, 1  ;;  %v734_v60 = vrot.slane %v716_v53, 4  ;;  %v668_v61 = vadd.f32 %v1533_v17, %v667_v58  ;;  %v1032_v62 = vpop.f32.mrb[10].mxu1 }
 0x24e   : > { %v733_v63 = vmax.f32 %v731_v50, %v732_v55  ;;  %v741_v0 = vmax.f32 %v717_v51, %v740_v56  ;;  %v679_v1 = vadd.f32 %v1032_v62, %v1533_v17  ;;  %v670_v2 = vpop.f32.mrb[11].mxu1  ;;  %v708_v7 = vmax.f32 %v676_v57, 0.0 }
 0x24f   : > { %v727_v3 = vmax.f32 %v725_v52, %v726_v59  ;;  %v735_v4 = vmax.f32 %v716_v53, %v734_v60  ;;  %v671_v5 = vadd.f32 %v1533_v17, %v670_v2  ;;  %v706_v11 = vmax.f32 %v668_v61, 0.0 }
 0x250   : > { %v742_v6 = vrot.slane %v741_v0, 2  ;;  %v709_v8 = vmax.f32 %v679_v1, 0.0 }
 0x251   : > { %v779_v9 = vsel %vm778_vm0, %v733_v63, %v727_v3  ;;  %v736_v10 = vrot.slane %v735_v4, 2  ;;  %v707_v12 = vmax.f32 %v671_v5, 0.0 }
 0x252   : > { %v743_v13 = vmax.f32 %v741_v0, %v742_v6  ;;  %v719_v14 = vmax.f32 %v708_v7, %v709_v8 }
 0x253   : > { %v737_v15 = vmax.f32 %v735_v4, %v736_v10  ;;  %v718_v16 = vmax.f32 %v706_v11, %v707_v12  ;;  %v1035_v18 = vpop.f32.mrb[12].mxu1 }
 0x254   : > { %v744_v19 = vrot.slane %v743_v13, 1  ;;  %v752_v20 = vrot.slane %v719_v14, 4  ;;  %v692_v21 = vadd.f32 %v1035_v18, %v1533_v17  ;;  %v683_v22 = vpop.f32.mrb[13].mxu1 }
 0x255   : > { %v738_v23 = vrot.slane %v737_v15, 1  ;;  %v746_v24 = vrot.slane %v718_v16, 4  ;;  %v684_v25 = vadd.f32 %v1533_v17, %v683_v22  ;;  %v1036_v26 = vpop.f32.mrb[14].mxu1 }
 0x256   : > { %v753_v27 = vmax.f32 %v719_v14, %v752_v20  ;;  %v695_v28 = vadd.f32 %v1036_v26, %v1533_v17  ;;  %v686_v29 = vpop.f32.mrb[15].mxu1  ;;  %v745_v33 = vmax.f32 %v743_v13, %v744_v19  ;;  %v712_v35 = vmax.f32 %v692_v21, 0.0 }
 0x257   : > { %v739_v30 = vmax.f32 %v737_v15, %v738_v23  ;;  %v747_v31 = vmax.f32 %v718_v16, %v746_v24  ;;  %v687_v32 = vadd.f32 %v1533_v17, %v686_v29  ;;  %v710_v39 = vmax.f32 %v684_v25, 0.0 }
 0x258   : > { %v754_v34 = vrot.slane %v753_v27, 2  ;;  %v713_v36 = vmax.f32 %v695_v28, 0.0 }
 0x259   : > { %v781_v37 = vsel %vm780_vm1, %v739_v30, %v779_v9  ;;  %v748_v38 = vrot.slane %v747_v31, 2  ;;  %v711_v40 = vmax.f32 %v687_v32, 0.0 }
 0x25a   : > { %v755_v41 = vmax.f32 %v753_v27, %v754_v34  ;;  %v783_v42 = vsel %vm782_vm2, %v745_v33, %v781_v37  ;;  %v721_v43 = vmax.f32 %v712_v35, %v713_v36 }
 0x25b   : > { %v749_v44 = vmax.f32 %v747_v31, %v748_v38  ;;  %v720_v45 = vmax.f32 %v710_v39, %v711_v40 }
 0x25c   : > { %v756_v46 = vrot.slane %v755_v41, 1  ;;  %v764_v47 = vrot.slane %v721_v43, 4 }
 0x25d   : > { %v750_v48 = vrot.slane %v749_v44, 1  ;;  %v758_v49 = vrot.slane %v720_v45, 4 }
 0x25e   : > { %v765_v17 = vmax.f32 %v721_v43, %v764_v47  ;;  %v757_v52 = vmax.f32 %v755_v41, %v756_v46 }
 0x25f   : > { %v751_v50 = vmax.f32 %v749_v44, %v750_v48  ;;  %v759_v51 = vmax.f32 %v720_v45, %v758_v49 }
 0x260   : > { %v766_v53 = vrot.slane %v765_v17, 2 }
 0x261   : > { %v785_v54 = vsel %vm784_vm3, %v751_v50, %v783_v42  ;;  %v760_v55 = vrot.slane %v759_v51, 2 }
 0x262   : > { %v767_v56 = vmax.f32 %v765_v17, %v766_v53  ;;  %v787_v57 = vsel %vm786_vm4, %v757_v52, %v785_v54 }
 0x263   : > { %v761_v58 = vmax.f32 %v759_v51, %v760_v55 }
 0x264   : > { %v768_v59 = vrot.slane %v767_v56, 1 }
 0x265   : > { %v762_v60 = vrot.slane %v761_v58, 1 }
 0x266   : > { %v769_v62 = vmax.f32 %v767_v56, %v768_v59 }
 0x267   : > { %v763_v61 = vmax.f32 %v761_v58, %v762_v60 }
 0x269   : > { %v789_v63 = vsel %vm788_vm5, %v763_v61, %v787_v57 }
 0x26a   : > { %v791_v0 = vsel %vm790_vm6, %v769_v62, %v789_v63 }
 0x26b   : > { %793 = vst [vmem:[%s271_s12] sm:$0xff] %v791_v0 }
 0x26c   : > { %1229 = shalt.err (!%p1226_p1)
}
 0x26d   : > { %s1230_s14 = scalar_lea.hbm %s1556_s17, 128  ;;  %s1234_s15 = scalar_lea.hbm %s1605_s5, 256 }
 0x26e   : > { %p1231_p13 = scmp.ne.s32.totalorder %s1556_s17, %s1230_s14  ;;  %p1235_p4 = scmp.lt.u32.totalorder %s1556_s17, %s1605_s5 }
 0x26f   : > { %p1236_p5 = scmp.lt.u32.totalorder %s1234_s15, %s1230_s14  ;;  %p1238_p11 = scmp.lt.u32.totalorder %s1230_s14, %s1556_s17 }
 0x270   : > { %p1232_p6 = pnand %p1231_p13, %p1619_p0 }
 0x271   : > { %p1237_p8 = por %p1236_p5, %p1235_p4 }
 0x272   : > { %p1233_p10 = pneg %p1232_p6 }
 0x273   : > { %p1239_p2 = por %p1238_p11, %p1237_p8 }
 0x275   : > { %p1240_p3 = pnand %p1239_p2, %p1233_p10 }
 0x277   : > { %1243 = shalt.err (!%p1240_p3)
}
 0x278   : > { %1047 = dma.vmem_to_hbm [thread:$0]  (%p1619_p0), %s1558_s13, 128, %s1556_s17, %s795_s7  }
 0x279 PF: > { %s820_s28 = sand.u32 1, %s1274_s18   ;;  %p1620_p7 = scmp.ne.s32.totalorder %s1610_s25, 0 }
 0x27a   : > { %p1621_p9 = scmp.ge.s32.totalorder %s1286_s21, 2  ;;  %s821_s12 = scalar_lea.sflag [#allocation4], %s820_s28 }
 0x27c   : > { %p1061_p12 = pnand %p1621_p9, %p1620_p7 }
 0x27e   : > { %1269 = dma.done.wait (!%p1061_p12), %s821_s12, 128  }
 0x27f   : > { %1271 = vsyncadd (!%p1061_p12), %s821_s12, 4294967168  ;;  %p19_p1 = scmp.ge.s32.totalorder %s1440_s29, 4   ;;  %s1622_s18 = smov %s1278_s19 }
 0x280   : > { %s1623_s19 = smov %s1282_s20  ;;  %s1624_s20 = smov %s1456_s27 }
 0x281   : > { %s1625_s21 = smov %s1440_s29  ;;  %21 = sbr.rel (!%p19_p1) target bundleno = 6 (0x6), region = 93 }
 0x288   :  { %826 = vsyncpa [#allocation3], 1 }
 0x289   :  { %828 = vsyncpa [#allocation3 + $0x1], 1 }
 0x28a   :  { %829 = vsyncpa [#allocation6], 1 }
 0x28b   :  { %830 = vsyncpa [#allocation4], 1 }
 0x28c   :  { %832 = vsyncpa [#allocation4 + $0x1], 1 }

</bundles_post_ra>
